<compile_context>
chip_gen: v7x
topology: tpu7x:2x2x1
jax: 0.10.0
libtpu: 0.0.40
codegen_flags: <defaults>
</compile_context>

<pallas_src>
import functools

import jax
import jax.numpy as jnp
import numpy as np
from jax import lax
from jax.experimental import pallas as pl
from jax.experimental.pallas import tpu as pltpu


def _leaky_relu(x):
    # single VALU max instead of cmp+select
    return jnp.maximum(x, 0.01 * x)


# ---------------------------------------------------------------------------
# One fused kernel: MHA (shots + queries, block-diagonal) + fe conv stack +
# channel attention + w_h modulation + prototypes + L2-norm + cosine logits.
# ---------------------------------------------------------------------------
def fused_kernel(x_ref, mask_ref, wqkv_ref, wfc_ref, bfc_ref, g_ref, b_ref,
                 w1e_ref, w2_ref, wfqkv_ref, cmask3_ref, gather_ref, avg_ref,
                 temp_ref, o_ref, *, x_shot_len, Cf):
    D = x_ref.shape[1]
    x = x_ref[...]                                                          # (N, D)

    # ---- MultiHeadAttention (n_head=1), both sequences in one pass ----
    qkv = jnp.dot(x, wqkv_ref[...], preferred_element_type=jnp.float32)    # (N, 3D)
    q = qkv[:, :D]                 # 1/sqrt(d_k) already folded into q weights
    k = qkv[:, D:2 * D]
    v = qkv[:, 2 * D:]
    attn = lax.dot_general(q, k, (((1,), (1,)), ((), ())),
                           preferred_element_type=jnp.float32)              # (N, N)
    attn = attn + mask_ref[...]    # block-diagonal: shots never attend queries
    attn = attn - jnp.max(attn, axis=-1, keepdims=True)
    e = jnp.exp(attn)
    p = e * pl.reciprocal(jnp.sum(e, axis=-1, keepdims=True), approx=True)
    # TODO(synk): nn.Dropout (attn p=0.1, output p=0.5) is identity in eval mode.
    out = jnp.dot(p, v, preferred_element_type=jnp.float32)                 # (N, D)
    out = jnp.dot(out, wfc_ref[...], preferred_element_type=jnp.float32) + bfc_ref[...]
    out = out + x                                                           # residual
    # single-pass LayerNorm (sum & sum-of-squares)
    inv_d = 1.0 / D
    mean = jnp.sum(out, axis=-1, keepdims=True) * inv_d
    var = jnp.sum(out * out, axis=-1, keepdims=True) * inv_d - mean * mean
    y = (out - mean) * lax.rsqrt(var + 1e-5) * g_ref[...] + b_ref[...]      # (N, D)

    # ---- hard-attention branch: fe conv stack (class-mean folded in w1e) ----
    a1 = _leaky_relu(jnp.dot(w1e_ref[...], x,
                             preferred_element_type=jnp.float32))           # (64, D)
    a2 = _leaky_relu(jnp.dot(w2_ref[...], a1,
                             preferred_element_type=jnp.float32))           # (32, D)
    # f_q/f_k/f_v 1x1 convs with the Cf-row broadcast pre-folded into the weight
    expanded = jnp.dot(wfqkv_ref[...], a2,
                       preferred_element_type=jnp.float32)                  # (3Cf, D)
    cmask3 = cmask3_ref[...]                                                # (3Cf, D) 0/1
    folded = jnp.dot(expanded * cmask3, gather_ref[...],
                     preferred_element_type=jnp.float32)                    # (3Cf, P)
    xq_c = folded[:Cf]             # 1/sqrt(P) already folded into the f_q rows
    xk_c = folded[Cf:2 * Cf]
    xv_c = folded[2 * Cf:]

    # channel attention: softmax(xq @ xk.T / sqrt(P)) @ xv
    s = lax.dot_general(xq_c, xk_c, (((1,), (1,)), ((), ())),
                        preferred_element_type=jnp.float32)                 # (Cf, Cf)
    s = s - jnp.max(s, axis=-1, keepdims=True)
    es = jnp.exp(s)
    pa = es * pl.reciprocal(jnp.sum(es, axis=-1, keepdims=True), approx=True)
    w_cp = jnp.dot(pa, xv_c, preferred_element_type=jnp.float32)            # (Cf, P)

    # unfold (Cf, P) back to a flat (1, D) modulation vector in (c, h, w) order
    tmp = lax.dot_general(w_cp, gather_ref[...], (((1,), (1,)), ((), ())),
                          preferred_element_type=jnp.float32)               # (Cf, D)
    w_flat = jnp.sum(tmp * cmask3[:Cf], axis=0, keepdims=True)              # (1, D)

    # ---- modulation + prototypes + cosine logits ----
    ys = y[:x_shot_len] * w_flat                                            # (S, D)
    yq = y[x_shot_len:] * w_flat                                            # (Q, D)
    proto = jnp.dot(avg_ref[...], ys, preferred_element_type=jnp.float32)   # (n_ways, D)
    proto = proto * lax.rsqrt(
        jnp.maximum(jnp.sum(proto * proto, axis=-1, keepdims=True), 1e-24))  # F.normalize
    yq = yq * lax.rsqrt(
        jnp.maximum(jnp.sum(yq * yq, axis=-1, keepdims=True), 1e-24))
    logits = lax.dot_general(yq, proto, (((1,), (1,)), ((), ())),
                             preferred_element_type=jnp.float32)            # (Q, n_ways)
    o_ref[0] = logits * temp_ref[0]


def meta_baseline_fused(x_tot_flat, params, consts, *, n_ways, q_shots,
                        x_shot_len, Cf):
    N, D = x_tot_flat.shape
    mha = params["mha"]
    fe = params["fe"]
    kern = functools.partial(fused_kernel, x_shot_len=x_shot_len, Cf=Cf)

    def full(shape):
        return pl.BlockSpec(shape, lambda i, _s=shape: (0,) * len(_s))

    return pl.pallas_call(
        kern,
        out_shape=jax.ShapeDtypeStruct((1, q_shots, n_ways), jnp.float32),
        grid=(1,),
        in_specs=[
            full((N, D)),                       # encoder features (flattened)
            full((N, N)),                       # block-diagonal additive mask
            full((D, 3 * D)),                   # fused q/k/v projection
            full((D, D)),                       # fc weight
            full((1, D)),                       # fc bias
            full((1, D)),                       # LN gamma
            full((1, D)),                       # LN beta
            full(fe["w1_eff"].shape),           # fe conv-1 (class-mean folded)
            full(fe["w2"].shape),               # fe conv-2
            full(fe["wfqkv_exp"].shape),        # f_q/f_k/f_v (row-broadcast folded)
            full(consts["cmask3"].shape),       # channel mask (3Cf, D)
            full(consts["gather"].shape),       # flat<->(Cf,P) gather (D, P)
            full(consts["avg"].shape),          # class-mean prototype matrix
            pl.BlockSpec(memory_space=pltpu.MemorySpace.SMEM),   # temperature
        ],
        out_specs=pl.BlockSpec((1, q_shots, n_ways), lambda i: (0, 0, 0)),
        compiler_params=pltpu.CompilerParams(dimension_semantics=("arbitrary",)),
    )(x_tot_flat, consts["attn_mask"], mha["w_qkv_t"], mha["wfc_t"], mha["bfc"],
      mha["gamma"], mha["beta"], fe["w1_eff"], fe["w2"], fe["wfqkv_exp"],
      consts["cmask3"], consts["gather"], consts["avg"], params["temp"])


# ---------------------------------------------------------------------------
# Trace-time constants (numpy; zero runtime cost, baked into the jaxpr)
# ---------------------------------------------------------------------------
def _build_constants(n_ways, k_shots, x_shot_len, x_query_len, Cf, P, D):
    N = x_shot_len + x_query_len
    # block-diagonal additive attention mask (shots / queries attend within group)
    mask = np.full((N, N), -1e30, np.float32)
    mask[:x_shot_len, :x_shot_len] = 0.0
    mask[x_shot_len:, x_shot_len:] = 0.0
    d_idx = np.arange(D)
    # channel mask: row c selects lanes with d // P == c, tiled for q/k/v
    cmask = (d_idx[None, :] // P == np.arange(Cf)[:, None]).astype(np.float32)
    cmask3 = np.tile(cmask, (3, 1))                                  # (3Cf, D)
    # gather: d -> d % P
    gather = (d_idx[:, None] % P == np.arange(P)[None, :]).astype(np.float32)
    # prototype class-mean matrix
    avg = (np.arange(x_shot_len)[None, :] // k_shots ==
           np.arange(n_ways)[:, None]).astype(np.float32) / float(k_shots)
    return {
        "attn_mask": jnp.asarray(mask),
        "cmask3": jnp.asarray(cmask3),
        "gather": jnp.asarray(gather),
        "avg": jnp.asarray(avg),
    }


# ---------------------------------------------------------------------------
# Glue: synthetic encoder + full MetaBaseline forward (1 pallas_call total)
# ---------------------------------------------------------------------------
def encoder(x, w_enc, Hf, Wf):
    # TODO(synk): original encoder comes from models.make(...) (external); using a
    # deterministic synthetic avgpool + 1x1-conv + ReLU stand-in in plain JAX.
    N, C, H, W = x.shape
    pooled = x.reshape(N, C, Hf, H // Hf, Wf, W // Wf).mean(axis=(3, 5))    # (N,C,Hf,Wf)
    feats = jnp.einsum("nchw,cd->ndhw", pooled, w_enc)                      # (N,Cf,Hf,Wf)
    return jnp.maximum(feats, 0.0)


@functools.partial(jax.jit, static_argnames=("Hf", "Wf"))
def meta_baseline_forward(x_shot, x_query, params, Hf, Wf):
    bs, n_ways, k_shots = x_shot.shape[:3]
    q_shots = x_query.shape[1]
    assert bs == 1  # the reference PyTorch code only supports bs == 1 (its .view calls)
    img_shape = x_shot.shape[-3:]
    xs = x_shot.reshape((-1,) + img_shape)
    xq = x_query.reshape((-1,) + img_shape)
    x_shot_len, x_query_len = xs.shape[0], xq.shape[0]
    x_all = jnp.concatenate([xs, xq], axis=0)
    x_tot = encoder(x_all, params["enc_w"], Hf, Wf)                         # (N,Cf,Hf,Wf)
    N, Cf, Hf_, Wf_ = x_tot.shape
    D = Cf * Hf_ * Wf_
    P = Hf_ * Wf_
    x_tot_flat = x_tot.reshape(N, D)                                        # (c,h,w) flatten

    consts = _build_constants(n_ways, k_shots, x_shot_len, x_query_len, Cf, P, D)
    logits = meta_baseline_fused(x_tot_flat, params, consts, n_ways=n_ways,
                                 q_shots=q_shots, x_shot_len=x_shot_len, Cf=Cf)
    return logits                                                           # (1, q_shots, n_ways)


def init_params(key, C_in, Cf, Hf, Wf, bs, n_ways, k_shots, q_shots):
    D = Cf * Hf * Wf
    P = Hf * Wf
    x_shot_len = bs * n_ways * k_shots
    x_query_len = bs * q_shots
    N = x_shot_len + x_query_len
    N_h = bs * n_ways + x_query_len       # == self.n (fe conv-1 kernel height)
    ks = jax.random.split(key, 8)
    std_qk = (2.0 / (D + D)) ** 0.5

    wq_t = std_qk * jax.random.normal(ks[1], (D, D), jnp.float32)
    wk_t = std_qk * jax.random.normal(ks[2], (D, D), jnp.float32)
    wv_t = std_qk * jax.random.normal(ks[3], (D, D), jnp.float32)
    # fuse q/k/v into one (D, 3D) weight; fold the 1/sqrt(d_k) score scale into q
    w_qkv_t = jnp.concatenate([wq_t / np.sqrt(float(D)), wk_t, wv_t], axis=1)

    # class-mean (shots) / pass-through (queries) selection matrix, folded into
    # the fe Conv2d(1, 64, (n, 1)) weight (both linear, applied before LeakyReLU)
    B = np.zeros((N_h, N), np.float32)
    for i in range(bs * n_ways):
        B[i, i * k_shots:(i + 1) * k_shots] = 1.0 / k_shots
    for r in range(x_query_len):
        B[bs * n_ways + r, x_shot_len + r] = 1.0
    w1 = 0.2 * jax.random.normal(ks[5], (64, N_h), jnp.float32)
    w1_eff = jnp.dot(w1, jnp.asarray(B))                       # (64, N)

    # f_q/f_k/f_v 1x1 convs; fold 1/sqrt(P) into f_q, pre-broadcast each row Cf
    # times so the in-kernel fold is a single (3*Cf, 32) matmul + mask + matmul
    wfqkv = 0.2 * jax.random.normal(ks[7], (3, 32), jnp.float32)
    wfqkv = wfqkv.at[0, :].multiply(1.0 / np.sqrt(float(P)))
    wfqkv_exp = jnp.repeat(wfqkv, Cf, axis=0)                   # (3*Cf, 32)

    return {
        "enc_w": 0.2 * jax.random.normal(ks[0], (C_in, Cf), jnp.float32),
        "mha": {
            "w_qkv_t": w_qkv_t,
            "wfc_t": std_qk * jax.random.normal(ks[4], (D, D), jnp.float32),
            "bfc": jnp.zeros((1, D), jnp.float32),
            "gamma": jnp.ones((1, D), jnp.float32),
            "beta": jnp.zeros((1, D), jnp.float32),
        },
        "fe": {
            "w1_eff": w1_eff,                                                 # Conv2d(1,64,(n,1)) ∘ class-mean
            "w2": 0.2 * jax.random.normal(ks[6], (32, 64), jnp.float32),      # Conv2d(64,32,1x1)
            "wfqkv_exp": wfqkv_exp,                                           # f_q/f_k/f_v 1x1 convs
        },
        "temp": jnp.array([10.0], jnp.float32),                               # learnable temp, init 10.0
    }


if __name__ == "__main__":
    bs, n_ways, k_shots, q_shots = 1, 2, 2, 4
    C_in, H_in, W_in = 3, 16, 16
    Cf, Hf, Wf = 8, 4, 4                # encoder output feature map; hdim = Cf*Hf*Wf = 128

    key = jax.random.PRNGKey(0)
    k1, k2, k3 = jax.random.split(key, 3)
    x_shot = jax.random.normal(k1, (bs, n_ways, k_shots, C_in, H_in, W_in), jnp.float32)
    x_query = jax.random.normal(k2, (bs, q_shots, C_in, H_in, W_in), jnp.float32)
    params = init_params(k3, C_in, Cf, Hf, Wf, bs, n_ways, k_shots, q_shots)

    logits = meta_baseline_forward(x_shot, x_query, params, Hf, Wf)
    logits = jax.block_until_ready(logits)
    assert logits.shape == (bs, q_shots, n_ways), logits.shape
    assert bool(jnp.all(jnp.isfinite(logits)))
    print("KERNEL_OK")
</pallas_src>

<mosaic_0001>
module attributes {stable_mosaic.version = 11 : i64} {
  func.func @fused_kernel(%arg0: i32, %arg1: memref<8x128xf32, #tpu.memory_space<vmem>>, %arg2: memref<8x8xf32, #tpu.memory_space<vmem>>, %arg3: memref<128x384xf32, #tpu.memory_space<vmem>>, %arg4: memref<128x128xf32, #tpu.memory_space<vmem>>, %arg5: memref<1x128xf32, #tpu.memory_space<vmem>>, %arg6: memref<1x128xf32, #tpu.memory_space<vmem>>, %arg7: memref<1x128xf32, #tpu.memory_space<vmem>>, %arg8: memref<64x8xf32, #tpu.memory_space<vmem>>, %arg9: memref<32x64xf32, #tpu.memory_space<vmem>>, %arg10: memref<24x32xf32, #tpu.memory_space<vmem>>, %arg11: memref<24x128xf32, #tpu.memory_space<vmem>>, %arg12: memref<128x16xf32, #tpu.memory_space<vmem>>, %arg13: memref<2x4xf32, #tpu.memory_space<vmem>>, %arg14: memref<1xf32, #tpu.memory_space<smem>>, %arg15: memref<1x4x2xf32, #tpu.memory_space<vmem>>) attributes {dimension_semantics = [#tpu.dimension_semantics<arbitrary>], iteration_bounds = array<i64: 1>, scalar_prefetch = 0 : i64, scratch_operands = 0 : i64, tpu.core_type = #tpu.core_type<tc>, window_params = [{pipeline_mode = #tpu.pipeline_mode<synchronous>, transform_indices = @transform_0, window_bounds = array<i64: 8, 128>}, {pipeline_mode = #tpu.pipeline_mode<synchronous>, transform_indices = @transform_1, window_bounds = array<i64: 8, 8>}, {pipeline_mode = #tpu.pipeline_mode<synchronous>, transform_indices = @transform_2, window_bounds = array<i64: 128, 384>}, {pipeline_mode = #tpu.pipeline_mode<synchronous>, transform_indices = @transform_3, window_bounds = array<i64: 128, 128>}, {pipeline_mode = #tpu.pipeline_mode<synchronous>, transform_indices = @transform_4, window_bounds = array<i64: 1, 128>}, {pipeline_mode = #tpu.pipeline_mode<synchronous>, transform_indices = @transform_5, window_bounds = array<i64: 1, 128>}, {pipeline_mode = #tpu.pipeline_mode<synchronous>, transform_indices = @transform_6, window_bounds = array<i64: 1, 128>}, {pipeline_mode = #tpu.pipeline_mode<synchronous>, transform_indices = @transform_7, window_bounds = array<i64: 64, 8>}, {pipeline_mode = #tpu.pipeline_mode<synchronous>, transform_indices = @transform_8, window_bounds = array<i64: 32, 64>}, {pipeline_mode = #tpu.pipeline_mode<synchronous>, transform_indices = @transform_9, window_bounds = array<i64: 24, 32>}, {pipeline_mode = #tpu.pipeline_mode<synchronous>, transform_indices = @transform_10, window_bounds = array<i64: 24, 128>}, {pipeline_mode = #tpu.pipeline_mode<synchronous>, transform_indices = @transform_11, window_bounds = array<i64: 128, 16>}, {pipeline_mode = #tpu.pipeline_mode<synchronous>, transform_indices = @transform_12, window_bounds = array<i64: 2, 4>}, {transform_indices = @transform_13, window_bounds = array<i64: 1>}, {pipeline_mode = #tpu.pipeline_mode<synchronous>, transform_indices = @transform_14, window_bounds = array<i64: 1, 4, 2>}]} {
    %c0 = arith.constant 0 : index
    %c0_0 = arith.constant 0 : index
    %0 = vector.load %arg1[%c0, %c0_0] : memref<8x128xf32, #tpu.memory_space<vmem>>, vector<8x128xf32>
    %c0_1 = arith.constant 0 : index
    %c0_2 = arith.constant 0 : index
    %1 = vector.load %arg3[%c0_1, %c0_2] : memref<128x384xf32, #tpu.memory_space<vmem>>, vector<128x384xf32>
    %cst = arith.constant dense<0.000000e+00> : vector<8x384xf32>
    %2 = tpu.matmul %0, %1, %cst {dimension_numbers = #tpu.dot_dimension_numbers<[1], [0], [0], [1], [0, 0, 1, 1], [], []>} : vector<8x128xf32>, vector<128x384xf32>, vector<8x384xf32> -> vector<8x384xf32>
    %3 = vector.extract_strided_slice %2 {offsets = [0, 0], sizes = [8, 128], strides = [1, 1]} : vector<8x384xf32> to vector<8x128xf32>
    %4 = vector.extract_strided_slice %2 {offsets = [0, 128], sizes = [8, 128], strides = [1, 1]} : vector<8x384xf32> to vector<8x128xf32>
    %5 = vector.extract_strided_slice %2 {offsets = [0, 256], sizes = [8, 128], strides = [1, 1]} : vector<8x384xf32> to vector<8x128xf32>
    %cst_3 = arith.constant dense<0.000000e+00> : vector<8x8xf32>
    %6 = tpu.matmul %3, %4, %cst_3 {dimension_numbers = #tpu.dot_dimension_numbers<[1], [1], [0], [0], [0, 0, 1, 0], [], []>} : vector<8x128xf32>, vector<8x128xf32>, vector<8x8xf32> -> vector<8x8xf32>
    %c0_4 = arith.constant 0 : index
    %c0_5 = arith.constant 0 : index
    %7 = vector.load %arg2[%c0_4, %c0_5] : memref<8x8xf32, #tpu.memory_space<vmem>>, vector<8x8xf32>
    %8 = arith.addf %6, %7 : vector<8x8xf32>
    %cst_6 = arith.constant dense<0xFF800000> : vector<8xf32>
    %9 = vector.multi_reduction <maximumf>, %8, %cst_6 [1] : vector<8x8xf32> to vector<8xf32>
    %10 = vector.shape_cast %9 : vector<8xf32> to vector<8x1xf32>
    %11 = vector.broadcast %10 : vector<8x1xf32> to vector<8x8xf32>
    %12 = arith.subf %8, %11 : vector<8x8xf32>
    %13 = math.exp %12 : vector<8x8xf32>
    %cst_7 = arith.constant dense<0.000000e+00> : vector<8xf32>
    %14 = vector.multi_reduction <add>, %13, %cst_7 [1] : vector<8x8xf32> to vector<8xf32>
    %15 = vector.shape_cast %14 : vector<8xf32> to vector<8x1xf32>
    %16 = tpu.reciprocal %15 {approx = true} : vector<8x1xf32> -> vector<8x1xf32>
    %17 = vector.broadcast %16 : vector<8x1xf32> to vector<8x8xf32>
    %18 = arith.mulf %13, %17 : vector<8x8xf32>
    %cst_8 = arith.constant dense<0.000000e+00> : vector<8x128xf32>
    %19 = tpu.matmul %18, %5, %cst_8 {dimension_numbers = #tpu.dot_dimension_numbers<[1], [0], [0], [1], [0, 0, 1, 1], [], []>} : vector<8x8xf32>, vector<8x128xf32>, vector<8x128xf32> -> vector<8x128xf32>
    %c0_9 = arith.constant 0 : index
    %c0_10 = arith.constant 0 : index
    %20 = vector.load %arg4[%c0_9, %c0_10] : memref<128x128xf32, #tpu.memory_space<vmem>>, vector<128x128xf32>
    %cst_11 = arith.constant dense<0.000000e+00> : vector<8x128xf32>
    %21 = tpu.matmul %19, %20, %cst_11 {dimension_numbers = #tpu.dot_dimension_numbers<[1], [0], [0], [1], [0, 0, 1, 1], [], []>} : vector<8x128xf32>, vector<128x128xf32>, vector<8x128xf32> -> vector<8x128xf32>
    %c0_12 = arith.constant 0 : index
    %c0_13 = arith.constant 0 : index
    %22 = vector.load %arg5[%c0_12, %c0_13] : memref<1x128xf32, #tpu.memory_space<vmem>>, vector<1x128xf32>
    %23 = vector.broadcast %22 : vector<1x128xf32> to vector<8x128xf32>
    %24 = arith.addf %21, %23 : vector<8x128xf32>
    %25 = arith.addf %24, %0 : vector<8x128xf32>
    %cst_14 = arith.constant dense<0.000000e+00> : vector<8xf32>
    %26 = vector.multi_reduction <add>, %25, %cst_14 [1] : vector<8x128xf32> to vector<8xf32>
    %27 = vector.shape_cast %26 : vector<8xf32> to vector<8x1xf32>
    %cst_15 = arith.constant 7.812500e-03 : f32
    %28 = vector.broadcast %cst_15 : f32 to vector<8x1xf32>
    %29 = arith.mulf %27, %28 : vector<8x1xf32>
    %30 = arith.mulf %25, %25 : vector<8x128xf32>
    %cst_16 = arith.constant dense<0.000000e+00> : vector<8xf32>
    %31 = vector.multi_reduction <add>, %30, %cst_16 [1] : vector<8x128xf32> to vector<8xf32>
    %32 = vector.shape_cast %31 : vector<8xf32> to vector<8x1xf32>
    %cst_17 = arith.constant 7.812500e-03 : f32
    %33 = vector.broadcast %cst_17 : f32 to vector<8x1xf32>
    %34 = arith.mulf %32, %33 : vector<8x1xf32>
    %35 = arith.mulf %29, %29 : vector<8x1xf32>
    %36 = arith.subf %34, %35 : vector<8x1xf32>
    %37 = vector.broadcast %29 : vector<8x1xf32> to vector<8x128xf32>
    %38 = arith.subf %25, %37 : vector<8x128xf32>
    %cst_18 = arith.constant 9.99999974E-6 : f32
    %39 = vector.broadcast %cst_18 : f32 to vector<8x1xf32>
    %40 = arith.addf %36, %39 : vector<8x1xf32>
    %41 = math.rsqrt %40 : vector<8x1xf32>
    %42 = vector.broadcast %41 : vector<8x1xf32> to vector<8x128xf32>
    %43 = arith.mulf %38, %42 : vector<8x128xf32>
    %c0_19 = arith.constant 0 : index
    %c0_20 = arith.constant 0 : index
    %44 = vector.load %arg6[%c0_19, %c0_20] : memref<1x128xf32, #tpu.memory_space<vmem>>, vector<1x128xf32>
    %45 = vector.broadcast %44 : vector<1x128xf32> to vector<8x128xf32>
    %46 = arith.mulf %43, %45 : vector<8x128xf32>
    %c0_21 = arith.constant 0 : index
    %c0_22 = arith.constant 0 : index
    %47 = vector.load %arg7[%c0_21, %c0_22] : memref<1x128xf32, #tpu.memory_space<vmem>>, vector<1x128xf32>
    %48 = vector.broadcast %47 : vector<1x128xf32> to vector<8x128xf32>
    %49 = arith.addf %46, %48 : vector<8x128xf32>
    %c0_23 = arith.constant 0 : index
    %c0_24 = arith.constant 0 : index
    %50 = vector.load %arg8[%c0_23, %c0_24] : memref<64x8xf32, #tpu.memory_space<vmem>>, vector<64x8xf32>
    %cst_25 = arith.constant dense<0.000000e+00> : vector<64x128xf32>
    %51 = tpu.matmul %50, %0, %cst_25 {dimension_numbers = #tpu.dot_dimension_numbers<[1], [0], [0], [1], [0, 0, 1, 1], [], []>} : vector<64x8xf32>, vector<8x128xf32>, vector<64x128xf32> -> vector<64x128xf32>
    %cst_26 = arith.constant 0.00999999977 : f32
    %52 = vector.broadcast %cst_26 : f32 to vector<64x128xf32>
    %53 = arith.mulf %52, %51 : vector<64x128xf32>
    %54 = arith.maximumf %51, %53 : vector<64x128xf32>
    %c0_27 = arith.constant 0 : index
    %c0_28 = arith.constant 0 : index
    %55 = vector.load %arg9[%c0_27, %c0_28] : memref<32x64xf32, #tpu.memory_space<vmem>>, vector<32x64xf32>
    %cst_29 = arith.constant dense<0.000000e+00> : vector<32x128xf32>
    %56 = tpu.matmul %55, %54, %cst_29 {dimension_numbers = #tpu.dot_dimension_numbers<[1], [0], [0], [1], [0, 0, 1, 1], [], []>} : vector<32x64xf32>, vector<64x128xf32>, vector<32x128xf32> -> vector<32x128xf32>
    %cst_30 = arith.constant 0.00999999977 : f32
    %57 = vector.broadcast %cst_30 : f32 to vector<32x128xf32>
    %58 = arith.mulf %57, %56 : vector<32x128xf32>
    %59 = arith.maximumf %56, %58 : vector<32x128xf32>
    %c0_31 = arith.constant 0 : index
    %c0_32 = arith.constant 0 : index
    %60 = vector.load %arg10[%c0_31, %c0_32] : memref<24x32xf32, #tpu.memory_space<vmem>>, vector<24x32xf32>
    %cst_33 = arith.constant dense<0.000000e+00> : vector<24x128xf32>
    %61 = tpu.matmul %60, %59, %cst_33 {dimension_numbers = #tpu.dot_dimension_numbers<[1], [0], [0], [1], [0, 0, 1, 1], [], []>} : vector<24x32xf32>, vector<32x128xf32>, vector<24x128xf32> -> vector<24x128xf32>
    %c0_34 = arith.constant 0 : index
    %c0_35 = arith.constant 0 : index
    %62 = vector.load %arg11[%c0_34, %c0_35] : memref<24x128xf32, #tpu.memory_space<vmem>>, vector<24x128xf32>
    %63 = arith.mulf %61, %62 : vector<24x128xf32>
    %c0_36 = arith.constant 0 : index
    %c0_37 = arith.constant 0 : index
    %64 = vector.load %arg12[%c0_36, %c0_37] : memref<128x16xf32, #tpu.memory_space<vmem>>, vector<128x16xf32>
    %cst_38 = arith.constant dense<0.000000e+00> : vector<24x16xf32>
    %65 = tpu.matmul %63, %64, %cst_38 {dimension_numbers = #tpu.dot_dimension_numbers<[1], [0], [0], [1], [0, 0, 1, 1], [], []>} : vector<24x128xf32>, vector<128x16xf32>, vector<24x16xf32> -> vector<24x16xf32>
    %66 = vector.extract_strided_slice %65 {offsets = [0, 0], sizes = [8, 16], strides = [1, 1]} : vector<24x16xf32> to vector<8x16xf32>
    %67 = vector.extract_strided_slice %65 {offsets = [8, 0], sizes = [8, 16], strides = [1, 1]} : vector<24x16xf32> to vector<8x16xf32>
    %68 = vector.extract_strided_slice %65 {offsets = [16, 0], sizes = [8, 16], strides = [1, 1]} : vector<24x16xf32> to vector<8x16xf32>
    %cst_39 = arith.constant dense<0.000000e+00> : vector<8x8xf32>
    %69 = tpu.matmul %66, %67, %cst_39 {dimension_numbers = #tpu.dot_dimension_numbers<[1], [1], [0], [0], [0, 0, 1, 0], [], []>} : vector<8x16xf32>, vector<8x16xf32>, vector<8x8xf32> -> vector<8x8xf32>
    %cst_40 = arith.constant dense<0xFF800000> : vector<8xf32>
    %70 = vector.multi_reduction <maximumf>, %69, %cst_40 [1] : vector<8x8xf32> to vector<8xf32>
    %71 = vector.shape_cast %70 : vector<8xf32> to vector<8x1xf32>
    %72 = vector.broadcast %71 : vector<8x1xf32> to vector<8x8xf32>
    %73 = arith.subf %69, %72 : vector<8x8xf32>
    %74 = math.exp %73 : vector<8x8xf32>
    %cst_41 = arith.constant dense<0.000000e+00> : vector<8xf32>
    %75 = vector.multi_reduction <add>, %74, %cst_41 [1] : vector<8x8xf32> to vector<8xf32>
    %76 = vector.shape_cast %75 : vector<8xf32> to vector<8x1xf32>
    %77 = tpu.reciprocal %76 {approx = true} : vector<8x1xf32> -> vector<8x1xf32>
    %78 = vector.broadcast %77 : vector<8x1xf32> to vector<8x8xf32>
    %79 = arith.mulf %74, %78 : vector<8x8xf32>
    %cst_42 = arith.constant dense<0.000000e+00> : vector<8x16xf32>
    %80 = tpu.matmul %79, %68, %cst_42 {dimension_numbers = #tpu.dot_dimension_numbers<[1], [0], [0], [1], [0, 0, 1, 1], [], []>} : vector<8x8xf32>, vector<8x16xf32>, vector<8x16xf32> -> vector<8x16xf32>
    %c0_43 = arith.constant 0 : index
    %c0_44 = arith.constant 0 : index
    %81 = vector.load %arg12[%c0_43, %c0_44] : memref<128x16xf32, #tpu.memory_space<vmem>>, vector<128x16xf32>
    %cst_45 = arith.constant dense<0.000000e+00> : vector<8x128xf32>
    %82 = tpu.matmul %80, %81, %cst_45 {dimension_numbers = #tpu.dot_dimension_numbers<[1], [1], [0], [0], [0, 0, 1, 0], [], []>} : vector<8x16xf32>, vector<128x16xf32>, vector<8x128xf32> -> vector<8x128xf32>
    %83 = vector.extract_strided_slice %62 {offsets = [0, 0], sizes = [8, 128], strides = [1, 1]} : vector<24x128xf32> to vector<8x128xf32>
    %84 = arith.mulf %82, %83 : vector<8x128xf32>
    %cst_46 = arith.constant dense<0.000000e+00> : vector<128xf32>
    %85 = vector.multi_reduction <add>, %84, %cst_46 [0] : vector<8x128xf32> to vector<128xf32>
    %86 = vector.shape_cast %85 : vector<128xf32> to vector<1x128xf32>
    %87 = vector.extract_strided_slice %49 {offsets = [0, 0], sizes = [4, 128], strides = [1, 1]} : vector<8x128xf32> to vector<4x128xf32>
    %88 = vector.broadcast %86 : vector<1x128xf32> to vector<4x128xf32>
    %89 = arith.mulf %87, %88 : vector<4x128xf32>
    %90 = vector.extract_strided_slice %49 {offsets = [4, 0], sizes = [4, 128], strides = [1, 1]} : vector<8x128xf32> to vector<4x128xf32>
    %91 = vector.broadcast %86 : vector<1x128xf32> to vector<4x128xf32>
    %92 = arith.mulf %90, %91 : vector<4x128xf32>
    %c0_47 = arith.constant 0 : index
    %c0_48 = arith.constant 0 : index
    %93 = vector.load %arg13[%c0_47, %c0_48] : memref<2x4xf32, #tpu.memory_space<vmem>>, vector<2x4xf32>
    %cst_49 = arith.constant dense<0.000000e+00> : vector<2x128xf32>
    %94 = tpu.matmul %93, %89, %cst_49 {dimension_numbers = #tpu.dot_dimension_numbers<[1], [0], [0], [1], [0, 0, 1, 1], [], []>} : vector<2x4xf32>, vector<4x128xf32>, vector<2x128xf32> -> vector<2x128xf32>
    %95 = arith.mulf %94, %94 : vector<2x128xf32>
    %cst_50 = arith.constant dense<0.000000e+00> : vector<2xf32>
    %96 = vector.multi_reduction <add>, %95, %cst_50 [1] : vector<2x128xf32> to vector<2xf32>
    %97 = vector.shape_cast %96 : vector<2xf32> to vector<2x1xf32>
    %cst_51 = arith.constant 1.000000e-24 : f32
    %98 = vector.broadcast %cst_51 : f32 to vector<2x1xf32>
    %99 = arith.maximumf %97, %98 : vector<2x1xf32>
    %100 = math.rsqrt %99 : vector<2x1xf32>
    %101 = vector.broadcast %100 : vector<2x1xf32> to vector<2x128xf32>
    %102 = arith.mulf %94, %101 : vector<2x128xf32>
    %103 = arith.mulf %92, %92 : vector<4x128xf32>
    %cst_52 = arith.constant dense<0.000000e+00> : vector<4xf32>
    %104 = vector.multi_reduction <add>, %103, %cst_52 [1] : vector<4x128xf32> to vector<4xf32>
    %105 = vector.shape_cast %104 : vector<4xf32> to vector<4x1xf32>
    %cst_53 = arith.constant 1.000000e-24 : f32
    %106 = vector.broadcast %cst_53 : f32 to vector<4x1xf32>
    %107 = arith.maximumf %105, %106 : vector<4x1xf32>
    %108 = math.rsqrt %107 : vector<4x1xf32>
    %109 = vector.broadcast %108 : vector<4x1xf32> to vector<4x128xf32>
    %110 = arith.mulf %92, %109 : vector<4x128xf32>
    %cst_54 = arith.constant dense<0.000000e+00> : vector<4x2xf32>
    %111 = tpu.matmul %110, %102, %cst_54 {dimension_numbers = #tpu.dot_dimension_numbers<[1], [1], [0], [0], [0, 0, 1, 0], [], []>} : vector<4x128xf32>, vector<2x128xf32>, vector<4x2xf32> -> vector<4x2xf32>
    %c0_55 = arith.constant 0 : index
    %112 = memref.load %arg14[%c0_55] : memref<1xf32, #tpu.memory_space<smem>>
    %113 = vector.broadcast %112 : f32 to vector<4x2xf32>
    %114 = arith.mulf %111, %113 : vector<4x2xf32>
    %c0_56 = arith.constant 0 : index
    %c0_57 = arith.constant 0 : index
    %c0_58 = arith.constant 0 : index
    %115 = vector.load %arg15[%c0_56, %c0_57, %c0_58] : memref<1x4x2xf32, #tpu.memory_space<vmem>>, vector<1x4x2xf32>
    %116 = vector.shape_cast %115 : vector<1x4x2xf32> to vector<4x2xf32>
    %117 = vector.shape_cast %114 : vector<4x2xf32> to vector<1x4x2xf32>
    tpu.vector_store %arg15[%c0_56, %c0_57, %c0_58], %117 {strides = array<i32>} : memref<1x4x2xf32, #tpu.memory_space<vmem>>, vector<1x4x2xf32>,
    return
  }
  func.func @transform_0(%arg0: i32) -> (i32, i32) {
    %c0_i32 = arith.constant 0 : i32
    %c0_i32_0 = arith.constant 0 : i32
    %c0_i32_1 = arith.constant 0 : i32
    return %c0_i32, %c0_i32_0 : i32, i32
  }
  func.func @transform_1(%arg0: i32) -> (i32, i32) {
    %c0_i32 = arith.constant 0 : i32
    %c0_i32_0 = arith.constant 0 : i32
    %c0_i32_1 = arith.constant 0 : i32
    return %c0_i32, %c0_i32_0 : i32, i32
  }
  func.func @transform_2(%arg0: i32) -> (i32, i32) {
    %c0_i32 = arith.constant 0 : i32
    %c0_i32_0 = arith.constant 0 : i32
    %c0_i32_1 = arith.constant 0 : i32
    return %c0_i32, %c0_i32_0 : i32, i32
  }
  func.func @transform_3(%arg0: i32) -> (i32, i32) {
    %c0_i32 = arith.constant 0 : i32
    %c0_i32_0 = arith.constant 0 : i32
    %c0_i32_1 = arith.constant 0 : i32
    return %c0_i32, %c0_i32_0 : i32, i32
  }
  func.func @transform_4(%arg0: i32) -> (i32, i32) {
    %c0_i32 = arith.constant 0 : i32
    %c0_i32_0 = arith.constant 0 : i32
    %c0_i32_1 = arith.constant 0 : i32
    return %c0_i32, %c0_i32_0 : i32, i32
  }
  func.func @transform_5(%arg0: i32) -> (i32, i32) {
    %c0_i32 = arith.constant 0 : i32
    %c0_i32_0 = arith.constant 0 : i32
    %c0_i32_1 = arith.constant 0 : i32
    return %c0_i32, %c0_i32_0 : i32, i32
  }
  func.func @transform_6(%arg0: i32) -> (i32, i32) {
    %c0_i32 = arith.constant 0 : i32
    %c0_i32_0 = arith.constant 0 : i32
    %c0_i32_1 = arith.constant 0 : i32
    return %c0_i32, %c0_i32_0 : i32, i32
  }
  func.func @transform_7(%arg0: i32) -> (i32, i32) {
    %c0_i32 = arith.constant 0 : i32
    %c0_i32_0 = arith.constant 0 : i32
    %c0_i32_1 = arith.constant 0 : i32
    return %c0_i32, %c0_i32_0 : i32, i32
  }
  func.func @transform_8(%arg0: i32) -> (i32, i32) {
    %c0_i32 = arith.constant 0 : i32
    %c0_i32_0 = arith.constant 0 : i32
    %c0_i32_1 = arith.constant 0 : i32
    return %c0_i32, %c0_i32_0 : i32, i32
  }
  func.func @transform_9(%arg0: i32) -> (i32, i32) {
    %c0_i32 = arith.constant 0 : i32
    %c0_i32_0 = arith.constant 0 : i32
    %c0_i32_1 = arith.constant 0 : i32
    return %c0_i32, %c0_i32_0 : i32, i32
  }
  func.func @transform_10(%arg0: i32) -> (i32, i32) {
    %c0_i32 = arith.constant 0 : i32
    %c0_i32_0 = arith.constant 0 : i32
    %c0_i32_1 = arith.constant 0 : i32
    return %c0_i32, %c0_i32_0 : i32, i32
  }
  func.func @transform_11(%arg0: i32) -> (i32, i32) {
    %c0_i32 = arith.constant 0 : i32
    %c0_i32_0 = arith.constant 0 : i32
    %c0_i32_1 = arith.constant 0 : i32
    return %c0_i32, %c0_i32_0 : i32, i32
  }
  func.func @transform_12(%arg0: i32) -> (i32, i32) {
    %c0_i32 = arith.constant 0 : i32
    %c0_i32_0 = arith.constant 0 : i32
    %c0_i32_1 = arith.constant 0 : i32
    return %c0_i32, %c0_i32_0 : i32, i32
  }
  func.func @transform_13(%arg0: i32) -> i32 {
    %c0_i32 = arith.constant 0 : i32
    %c0_i32_0 = arith.constant 0 : i32
    return %c0_i32 : i32
  }
  func.func @transform_14(%arg0: i32) -> (i32, i32, i32) {
    %c0_i32 = arith.constant 0 : i32
    %c0_i32_0 = arith.constant 0 : i32
    %c0_i32_1 = arith.constant 0 : i32
    %c0_i32_2 = arith.constant 0 : i32
    return %c0_i32, %c0_i32_0, %c0_i32_1 : i32, i32, i32
  }
}

</mosaic_0001>

<bundles_post_ra>
// kernel: meta_baseline_forward.1
= control target key start
LH: loop header
LB: loop body
LE: loop exit
PB: predicated region body
PF: predicated region fallthrough
CT: control target
= control target key end

     0   :  { %v1997_v3 = vmov 0.0   ;;  %v1998_v4 = vmov 0.0|0.0   ;;  %vm1999_vm0 = vmmov 0   ;;  %vm309_vm1 = vcmask 64512   ;;  %s2511_s2 = inlined_call_operand.vmem [shape: f32[128,384], index: 2, kind: input, shape index: {}]   ;;  %s2512_s0 = inlined_call_operand.vmem [shape: f32[8,128], index: 0, kind: input, shape index: {}]   ;;  %s2513_s1 = inlined_call_operand.vmem [shape: f32[8,8], index: 1, kind: input, shape index: {}]   ;;  %s2514_s3 = inlined_call_operand.vmem [shape: f32[128,128], index: 3, kind: input, shape index: {}]   ;;  %s2515_s7 = inlined_call_operand.vmem [shape: f32[64,8], index: 7, kind: input, shape index: {}]   ;;  %s2516_s8 = inlined_call_operand.vmem [shape: f32[32,64], index: 8, kind: input, shape index: {}]   ;;  %s2517_s4 = inlined_call_operand.vmem [shape: f32[1,128], index: 4, kind: input, shape index: {}]   ;;  %s2518_s11 = inlined_call_operand.vmem [shape: f32[128,16], index: 11, kind: input, shape index: {}]   ;;  %s2519_s9 = inlined_call_operand.vmem [shape: f32[24,32], index: 9, kind: input, shape index: {}]   ;;  %s2520_s10 = inlined_call_operand.vmem [shape: f32[24,128], index: 10, kind: input, shape index: {}]   ;;  %s2521_s5 = inlined_call_operand.vmem [shape: f32[1,128], index: 5, kind: input, shape index: {}]   ;;  %s2522_s6 = inlined_call_operand.vmem [shape: f32[1,128], index: 6, kind: input, shape index: {}]   ;;  %s2523_s12 = inlined_call_operand.vmem [shape: f32[2,4], index: 12, kind: input, shape index: {}]   ;;  %s2524_s13 = inlined_call_operand.<no memory space> [shape: f32[1], index: 13, kind: input, shape index: {}]   ;;  %s2525_s14 = inlined_call_operand.vmem [shape: f32[1,4,2], index: 14, kind: output, shape index: {}]  }
   0x1   :  { %v50_v0 = vld [vmem:[%s2511_s2 + $0x8] sm:$0xff]  ;;  %v53_v1 = vld [vmem:[%s2511_s2 + $0x20] sm:$0xff]  ;;  %161 = vmatprep.mubr.f32.mxu0 %v1997_v3  ;;  %1854 = vmatprep.subr.bf16.mxu1 %v1998_v4  ;;  %v52_v6 = vld [vmem:[%s2511_s2 + $0x18] sm:$0xff]  ;;  %vm674_vm2 = vcmask 523264   ;;  %vm783_vm3 = vcmask 261120   ;;  %vm975_vm4 = vcmask 130048  }
   0x2   :  { %v49_v2 = vld [vmem:[%s2511_s2] sm:$0xff]  ;;  %v1822_v5 = vpack.c.bf16 %v53_v1, %v50_v0  ;;  %v56_v7 = vld [vmem:[%s2511_s2 + $0x38] sm:$0xff]  ;;  %v59_v8 = vld [vmem:[%s2511_s2 + $0x50] sm:$0xff]  ;;  %1625 = vmatprep.mubr.msk.f32.mxu1 %vm1999_vm0, %v1997_v3  ;;  %vm1270_vm6 = vcmask 1043456   ;;  %vm1266_vm7 = vcmask 31744   ;;  %vm1353_vm8 = vcmask 1047556  }
   0x3   :  { %v1824_v9 = vpack.c.bf16 %v52_v6, %v49_v2  ;;  %v1826_v10 = vpack.c.bf16 %v59_v8, %v56_v7  ;;  %v55_v11 = vld [vmem:[%s2511_s2 + $0x30] sm:$0xff]  ;;  %v58_v12 = vld [vmem:[%s2511_s2 + $0x48] sm:$0xff]  ;;  %v65_v14 = vld [vmem:[%s2511_s2 + $0x80] sm:$0xff]  ;;  %vm1345_vm9 = vcmask 1041408   ;;  %vm1436_vm10 = vcmask 11264  }
   0x4   :  { %v62_v13 = vld [vmem:[%s2511_s2 + $0x68] sm:$0xff]  ;;  %1823 = vmatprep.subr.bf16.mxu0 %v1822_v5  ;;  %v1828_v15 = vpack.c.bf16 %v58_v12, %v55_v11  ;;  %v61_v17 = vld [vmem:[%s2511_s2 + $0x60] sm:$0xff]  ;;  %v64_v18 = vld [vmem:[%s2511_s2 + $0x78] sm:$0xff] }
   0x5   :  { %1825 = vmatpush1.bf16.msra.mxu0 %v1824_v9  ;;  %v1830_v16 = vpack.c.bf16 %v65_v14, %v62_v13  ;;  %v68_v19 = vld [vmem:[%s2511_s2 + $0x98] sm:$0xff]  ;;  %v71_v20 = vld [vmem:[%s2511_s2 + $0xb0] sm:$0xff]  ;;  %v1832_v21 = vpack.c.bf16 %v64_v18, %v61_v17  ;;  %v70_v24 = vld [vmem:[%s2511_s2 + $0xa8] sm:$0xff] }
   0x6   :  { %1827 = vmatprep.subr.bf16.mxu0 %v1826_v10  ;;  %v1834_v22 = vpack.c.bf16 %v71_v20, %v68_v19  ;;  %v67_v23 = vld [vmem:[%s2511_s2 + $0x90] sm:$0xff]  ;;  %v74_v25 = vld [vmem:[%s2511_s2 + $0xc8] sm:$0xff]  ;;  %v77_v26 = vld [vmem:[%s2511_s2 + $0xe0] sm:$0xff] }
   0x7   :  { %v51_v27 = vld [vmem:[%s2511_s2 + $0x10] sm:$0xff]  ;;  %v54_v28 = vld [vmem:[%s2511_s2 + $0x28] sm:$0xff]  ;;  %v57_v29 = vld [vmem:[%s2511_s2 + $0x40] sm:$0xff]  ;;  %v1836_v30 = vpack.c.bf16 %v70_v24, %v67_v23  ;;  %v1838_v33 = vpack.c.bf16 %v77_v26, %v74_v25 }
   0x8   :  { %v1855_v31 = vpack.c.bf16 %v54_v28, %v51_v27  ;;  %v60_v32 = vld [vmem:[%s2511_s2 + $0x58] sm:$0xff]  ;;  %v73_v34 = vld [vmem:[%s2511_s2 + $0xc0] sm:$0xff]  ;;  %v83_v37 = vld [vmem:[%s2511_s2 + $0x110] sm:$0xff] }
   0x9   :  { %1829 = vmatpush1.bf16.msra.mxu0 %v1828_v15  ;;  %v76_v35 = vld [vmem:[%s2511_s2 + $0xd8] sm:$0xff]  ;;  %v1858_v38 = vpack.c.bf16 %v60_v32, %v57_v29  ;;  %v63_v39 = vld [vmem:[%s2511_s2 + $0x70] sm:$0xff]  ;;  %v66_v40 = vld [vmem:[%s2511_s2 + $0x88] sm:$0xff] }
   0xa   :  { %1831 = vmatprep.subr.bf16.mxu0 %v1830_v16  ;;  %v80_v36 = vld [vmem:[%s2511_s2 + $0xf8] sm:$0xff]  ;;  %1856 = vmatpush3.bf16.msra.mxu1 %v1855_v31  ;;  %v1840_v41 = vpack.c.bf16 %v76_v35, %v73_v34  ;;  %v79_v43 = vld [vmem:[%s2511_s2 + $0xf0] sm:$0xff]  ;;  %v82_v44 = vld [vmem:[%s2511_s2 + $0x108] sm:$0xff]  ;;  %v1861_v47 = vpack.c.bf16 %v66_v40, %v63_v39 }
   0xb   :  { %1857 = vmatprep.subr.bf16.mxu1 %v1998_v4  ;;  %v1842_v42 = vpack.c.bf16 %v83_v37, %v80_v36  ;;  %v86_v45 = vld [vmem:[%s2511_s2 + $0x128] sm:$0xff]  ;;  %v89_v46 = vld [vmem:[%s2511_s2 + $0x140] sm:$0xff]  ;;  %v72_v49 = vld [vmem:[%s2511_s2 + $0xb8] sm:$0xff]  ;;  %v1844_v50 = vpack.c.bf16 %v82_v44, %v79_v43 }
   0xc   :  { %v69_v48 = vld [vmem:[%s2511_s2 + $0xa0] sm:$0xff]  ;;  %v1846_v51 = vpack.c.bf16 %v89_v46, %v86_v45  ;;  %v88_v53 = vld [vmem:[%s2511_s2 + $0x138] sm:$0xff]  ;;  %v95_v55 = vld [vmem:[%s2511_s2 + $0x170] sm:$0xff] }
   0xd   :  { %1833 = vmatpush1.bf16.msra.mxu0 %v1832_v21  ;;  %v85_v52 = vld [vmem:[%s2511_s2 + $0x120] sm:$0xff]  ;;  %v92_v54 = vld [vmem:[%s2511_s2 + $0x158] sm:$0xff]  ;;  %v1864_v56 = vpack.c.bf16 %v72_v49, %v69_v48  ;;  %v75_v57 = vld [vmem:[%s2511_s2 + $0xd0] sm:$0xff] }
   0xe   :  { %1835 = vmatprep.subr.bf16.mxu0 %v1834_v22  ;;  %1859 = vmatpush3.bf16.msra.mxu1 %v1858_v38  ;;  %v78_v58 = vld [vmem:[%s2511_s2 + $0xe8] sm:$0xff]  ;;  %v1848_v59 = vpack.c.bf16 %v88_v53, %v85_v52  ;;  %v1850_v60 = vpack.c.bf16 %v95_v55, %v92_v54  ;;  %v91_v61 = vld [vmem:[%s2511_s2 + $0x150] sm:$0xff]  ;;  %v81_v0 = vld [vmem:[%s2511_s2 + $0x100] sm:$0xff] }
   0xf   :  { %1860 = vmatprep.subr.bf16.mxu1 %v1998_v4  ;;  %v94_v62 = vld [vmem:[%s2511_s2 + $0x168] sm:$0xff]  ;;  %v1867_v63 = vpack.c.bf16 %v78_v58, %v75_v57  ;;  %v84_v1 = vld [vmem:[%s2511_s2 + $0x118] sm:$0xff]  ;;  %v87_v6 = vld [vmem:[%s2511_s2 + $0x130] sm:$0xff] }
  0x10   :  { %v1852_v2 = vpack.c.bf16 %v94_v62, %v91_v61  ;;  %v1870_v5 = vpack.c.bf16 %v84_v1, %v81_v0  ;;  %v90_v7 = vld [vmem:[%s2511_s2 + $0x148] sm:$0xff]  ;;  %v2225_v8 = vld [vmem:[%s2512_s0] sm:$0xff]  ;;  %v96_v11 = vld [vmem:[%s2511_s2 + $0x178] sm:$0xff] }
  0x11   :  { %1837 = vmatpush1.bf16.msra.mxu0 %v1836_v30  ;;  %v1873_v9 = vpack.c.bf16 %v90_v7, %v87_v6  ;;  %v93_v10 = vld [vmem:[%s2511_s2 + $0x160] sm:$0xff]  ;;  %v395_v28 = vld [vmem:[%s2514_s3 + $0x8] sm:$0xff]  ;;  %v396_v29 = vld [vmem:[%s2514_s3 + $0x10] sm:$0xff] }
  0x12   :  { %1839 = vmatprep.subr.bf16.mxu0 %v1838_v33  ;;  %1862 = vmatpush3.bf16.msra.mxu1 %v1861_v47  ;;  %v1876_v12 = vpack.c.bf16 %v96_v11, %v93_v10  ;;  %v238_v17 = vld [vmem:[%s2513_s1] sm:$0xff]  ;;  %v397_v31 = vld [vmem:[%s2514_s3 + $0x18] sm:$0xff]  ;;  %v399_v34 = vld [vmem:[%s2514_s3 + $0x28] sm:$0xff] }
  0x13   :  { %1863 = vmatprep.subr.bf16.mxu1 %v1998_v4  ;;  %v394_v27 = vld [vmem:[%s2514_s3] sm:$0xff]  ;;  %v1882_v32 = vpack.c.bf16 %v397_v31, %v396_v29  ;;  %v400_v36 = vld [vmem:[%s2514_s3 + $0x30] sm:$0xff]  ;;  %v401_v37 = vld [vmem:[%s2514_s3 + $0x38] sm:$0xff] }
  0x14   :  { %v1879_v30 = vpack.c.bf16 %v395_v28, %v394_v27  ;;  %v398_v33 = vld [vmem:[%s2514_s3 + $0x20] sm:$0xff]  ;;  %v1888_v38 = vpack.c.bf16 %v401_v37, %v400_v36  ;;  %v403_v40 = vld [vmem:[%s2514_s3 + $0x48] sm:$0xff]  ;;  %v405_v43 = vld [vmem:[%s2514_s3 + $0x58] sm:$0xff] }
  0x15   :  { %1841 = vmatpush1.bf16.msra.mxu0 %v1840_v41  ;;  %v1885_v35 = vpack.c.bf16 %v399_v34, %v398_v33  ;;  %v402_v39 = vld [vmem:[%s2514_s3 + $0x40] sm:$0xff]  ;;  %v407_v46 = vld [vmem:[%s2514_s3 + $0x68] sm:$0xff]  ;;  %v408_v48 = vld [vmem:[%s2514_s3 + $0x70] sm:$0xff] }
  0x16   :  { %1843 = vmatprep.subr.bf16.mxu0 %v1842_v42  ;;  %1865 = vmatpush3.bf16.msra.mxu1 %v1864_v56  ;;  %v1891_v41 = vpack.c.bf16 %v403_v40, %v402_v39  ;;  %v404_v42 = vld [vmem:[%s2514_s3 + $0x50] sm:$0xff]  ;;  %v406_v45 = vld [vmem:[%s2514_s3 + $0x60] sm:$0xff]  ;;  %v409_v49 = vld [vmem:[%s2514_s3 + $0x78] sm:$0xff] }
  0x17   :  { %1866 = vmatprep.subr.bf16.mxu1 %v1998_v4  ;;  %v1894_v44 = vpack.c.bf16 %v405_v43, %v404_v42  ;;  %v1897_v47 = vpack.c.bf16 %v407_v46, %v406_v45  ;;  %v517_v54 = vld [vmem:[%s2515_s7] sm:$0xff]  ;;  %v518_v55 = vld [vmem:[%s2515_s7 + $0x8] sm:$0xff]  ;;  %v519_v56 = vld [vmem:[%s2515_s7 + $0x10] sm:$0xff] }
  0x18   :  { %v520_v57 = vld [vmem:[%s2515_s7 + $0x18] sm:$0xff]  ;;  %v521_v58 = vld [vmem:[%s2515_s7 + $0x20] sm:$0xff]  ;;  %v672_v33 = vld [vmem:[%s2516_s8 + $0x10] sm:$0xff] }
  0x19   :  { %1845 = vmatpush1.bf16.msra.mxu0 %v1844_v50  ;;  %v1900_v50 = vpack.c.bf16 %v409_v49, %v408_v48  ;;  %v524_v61 = vld [vmem:[%s2515_s7 + $0x38] sm:$0xff]  ;;  %v670_v62 = vld [vmem:[%s2516_s8] sm:$0xff]  ;;  %vm1950_vm5 = vmpackc.low %vm975_vm4, %vm975_vm4 }
  0x1a   :  { %1847 = vmatprep.subr.bf16.mxu0 %v1846_v51  ;;  %1868 = vmatpush3.bf16.msra.mxu1 %v1867_v63  ;;  %v673_v34 = vld [vmem:[%s2516_s8 + $0x18] sm:$0xff] }
  0x1b   :  { %1869 = vmatprep.subr.bf16.mxu1 %v1998_v4 }
  0x1d   :  { %1849 = vmatpush1.bf16.msra.mxu0 %v1848_v59  ;;  %v522_v59 = vld [vmem:[%s2515_s7 + $0x28] sm:$0xff] }
  0x1e   :  { %1851 = vmatprep.subr.bf16.mxu0 %v1850_v60  ;;  %1871 = vmatpush3.bf16.msra.mxu1 %v1870_v5  ;;  %v523_v60 = vld [vmem:[%s2515_s7 + $0x30] sm:$0xff] }
  0x1f   :  { %1872 = vmatprep.subr.bf16.mxu1 %v1998_v4 }
  0x21   :  { %1853 = vmatpush1.bf16.msra.mxu0 %v1852_v2 }
  0x22   :  { %1878 = vmatprep.subr.bf16.mxu0 %v1998_v4  ;;  %1874 = vmatpush3.bf16.msra.mxu1 %v1873_v9 }
  0x23   :  { %1875 = vmatprep.subr.bf16.mxu1 %v1998_v4 }
  0x24   :  { %162 = vmatmul.mubr.f32.vlgmr.msra.gmra.mrb[0].mxu0 %v2225_v8 }
  0x25   :  { %1670 = vmatprep.mubr.msk.f32.mxu0 %vm1999_vm0, %v1997_v3  ;;  %1880 = vmatpush3.bf16.msra.mxu0 %v1879_v30 }
  0x26   :  { %1877 = vmatpush3.bf16.msra.mxu1 %v1876_v12  ;;  %1881 = vmatprep.subr.bf16.mxu0 %v1998_v4 }
  0x27   :  { %1628 = vmatprep.subr.mxu1 %v1997_v3 }
  0x29   :  { %1626 = vmatmul.mubr.f32.vlgmr.msra.gmra.mrb[0].mxu1 %v2225_v8  ;;  %1883 = vmatpush3.bf16.msra.mxu0 %v1882_v32  ;;  %v671_v32 = vld [vmem:[%s2516_s8 + $0x8] sm:$0xff] }
  0x2a   :  { %1630 = vmatprep.mubr.msk.f32.mxu1 %vm1999_vm0, %v1997_v3  ;;  %1884 = vmatprep.subr.bf16.mxu0 %v1998_v4 }
  0x2d   :  { %1886 = vmatpush3.bf16.msra.mxu0 %v1885_v35  ;;  %v1443_v35 = vld [vmem:[%s2517_s4] ss:$0 sm:$0xff] }
  0x2e   :  { %1887 = vmatprep.subr.bf16.mxu0 %v1998_v4 }
  0x31   :  { %1889 = vmatpush3.bf16.msra.mxu0 %v1888_v38 }
  0x32   :  { %1890 = vmatprep.subr.bf16.mxu0 %v1998_v4 }
  0x35   :  { %1892 = vmatpush3.bf16.msra.mxu0 %v1891_v41 }
  0x36   :  { %1893 = vmatprep.subr.bf16.mxu0 %v1998_v4 }
  0x39   :  { %1895 = vmatpush3.bf16.msra.mxu0 %v1894_v44 }
  0x3a   :  { %1896 = vmatprep.subr.bf16.mxu0 %v1998_v4 }
  0x3d   :  { %1898 = vmatpush3.bf16.msra.mxu0 %v1897_v47 }
  0x3e   :  { %1899 = vmatprep.subr.bf16.mxu0 %v1998_v4 }
  0x41   :  { %1901 = vmatpush3.bf16.msra.mxu0 %v1900_v50 }
  0x42   :  { %1948 = vmatprep.subr.bf16.mxu0 %v1998_v4 }
  0xf7   :  { %v163_v13 = vpop.f32.mrb[0].mxu0 }
  0xf8   :  { %v165_v14 = vpop.f32.mrb[1].mxu0 }
  0xf9   :  { %1629 = vmatpush3.xpose.msra.mxu1 %v165_v14 }
  0xfa   :  { %1633 = vmatprep.subr.mxu1 %v1997_v3 }
  0xfc   :  { %1631 = vmatmul.mubr.f32.vlgmr.msra.gmra.mrb[2].mxu1 %v163_v13  ;;  %v234_v15 = vpop.f32.mrb[0].mxu1 }
  0xfd   :  { %1635 = vmatprep.mubr.msk.f32.mxu1 %vm1999_vm0, %v1997_v3  ;;  %v1627_v16 = vpop.f32.mrb[1].mxu1  ;;  %1634 = vmatpush3.msra.mxu1 %v234_v15 }
  0xfe   :  { %1673 = vmatprep.subr.mxu1 %v2225_v8 }
 0x1cf   :  { %v305_v18 = vpop.f32.mrb[2].mxu1 }
 0x1d0   :  { %v306_v19 = vadd.f32 %v305_v18, %v238_v17  ;;  %v1632_v20 = vpop.f32.mrb[3].mxu1 }
 0x1d2   :  { %v310_v21 = vsel %vm309_vm1, %v306_v19, -inf }
 0x1d3   :  { %311 = vmax.xlane.f32.xlu0 %v310_v21 }
 0x260   :  { %v312_v22 = vpop.xlane.xlu0 %311 }
 0x261   :  { %v313_v23 = vsub.f32 %v306_v19, %v312_v22 }
 0x263   :  { %v314_v24 = vmul.f32 1.442695, %v313_v23 }
 0x265   :  { %1983 = vpow2.f32 %v314_v24 }
 0x26f   :  { %v1984_v25 = vpop.eup %1983 }
 0x270   :  { %v316_v26 = vsel %vm309_vm1, %v1984_v25, 0.0 }
 0x271   :  { %317 = vadd.xlane.f32.xlu0 %v316_v26 }
 0x2fe   :  { %v318_v51 = vpop.xlane.xlu0 %317 }
 0x2ff   :  { %1985 = vrcp.f32 %v318_v51 }
 0x309   :  { %v1986_v52 = vpop.eup %1985 }
 0x30a   :  { %v320_v53 = vmul.f32 %v1986_v52, %v1984_v25 }
 0x30c   :  { %1636 = vmatmul.mubr.msk.f32.vlgmr.msra.gmra.mrb[4].mxu1 %vm309_vm1, %v320_v53  ;;  %v880_v53 = vld [vmem:[%s2518_s11 + $0x8] sm:$0xff] }
 0x30d   :  { %1674 = vmatpush3.msra.mxu1 %v2225_v8  ;;  %1675 = vmatprep.mubr.msk.f32.mxu1 %vm309_vm1, %v517_v54 }
 0x310   :  { %1676 = vmatmul.mubr.msk.f32.vlgmr.msra.gmra.mrb[6].mxu1 %vm309_vm1, %v518_v55  ;;  %v780_v55 = vld [vmem:[%s2519_s9] sm:$0xff] }
 0x311   :  { %1678 = vmatprep.mubr.msk.f32.mxu1 %vm309_vm1, %v519_v56 }
 0x314   :  { %1679 = vmatmul.mubr.msk.f32.gmra.mrb[8].mxu1 %vm309_vm1, %v520_v57  ;;  %v881_v57 = vld [vmem:[%s2518_s11 + $0x10] sm:$0xff] }
 0x315   :  { %1681 = vmatprep.mubr.msk.f32.mxu1 %vm309_vm1, %v521_v58  ;;  %v882_v58 = vld [vmem:[%s2518_s11 + $0x18] sm:$0xff] }
 0x318   :  { %1682 = vmatmul.mubr.msk.f32.gmra.mrb[10].mxu1 %vm309_vm1, %v522_v59  ;;  %v781_v59 = vld [vmem:[%s2519_s9 + $0x8] sm:$0xff] }
 0x319   :  { %1684 = vmatprep.mubr.msk.f32.mxu1 %vm309_vm1, %v523_v60  ;;  %v1928_v60 = vpack.c.bf16 %v882_v58, %v881_v57 }
 0x31c   :  { %1685 = vmatmul.mubr.msk.f32.gmra.mrb[12].mxu1 %vm309_vm1, %v524_v61  ;;  %v883_v61 = vld [vmem:[%s2518_s11 + $0x20] sm:$0xff] }
 0x31d   :  { %1703 = vmatprep.mubr.msk.f32.mxu1 %vm674_vm2, %v670_v62  ;;  %v884_v62 = vld [vmem:[%s2518_s11 + $0x28] sm:$0xff] }
 0x3df   :  { %v390_v63 = vpop.f32.mrb[4].mxu1 }
 0x3e0   :  { %v1637_v0 = vpop.f32.mrb[5].mxu1  ;;  %1671 = vmatmul.mubr.f32.vlgmr.msra.gmra.mrb[2].mxu0 %v390_v63  ;;  %v1931_v63 = vpack.c.bf16 %v884_v62, %v883_v61 }
 0x3e1   :  { %1809 = vmatprep.mubr.msk.f32.mxu0 %vm1999_vm0, %v1997_v3  ;;  %v782_v0 = vld [vmem:[%s2519_s9 + $0x10] sm:$0xff] }
 0x3e3   :  { %v1677_v1 = vpop.f32.mrb[6].mxu1 }
 0x3e4   :  { %v655_v2 = vmul.f32 0.01, %v1677_v1  ;;  %v615_v5 = vpop.f32.mrb[7].mxu1 }
 0x3e5   :  { %v654_v6 = vmul.f32 0.01, %v615_v5 }
 0x3e6   :  { %v663_v7 = vmax.f32 %v1677_v1, %v655_v2  ;;  %v885_v1 = vld [vmem:[%s2518_s11 + $0x30] sm:$0xff]  ;;  %v886_v2 = vld [vmem:[%s2518_s11 + $0x38] sm:$0xff] }
 0x3e7   :  { %v662_v9 = vmax.f32 %v615_v5, %v654_v6  ;;  %v1680_v10 = vpop.f32.mrb[8].mxu1  ;;  %v1934_v5 = vpack.c.bf16 %v886_v2, %v885_v1  ;;  %v887_v6 = vld [vmem:[%s2518_s11 + $0x40] sm:$0xff] }
 0x3e8   :  { %v657_v11 = vmul.f32 0.01, %v1680_v10  ;;  %v625_v12 = vpop.f32.mrb[9].mxu1  ;;  %v1444_v1 = vld [vmem:[%s2521_s5] ss:$0 sm:$0xff] }
 0x3e9   :  { %v1902_v13 = vpack.c.bf16 %v663_v7, %v662_v9  ;;  %v656_v14 = vmul.f32 0.01, %v625_v12  ;;  %v888_v7 = vld [vmem:[%s2518_s11 + $0x48] sm:$0xff] }
 0x3ea   :  { %v665_v15 = vmax.f32 %v1680_v10, %v657_v11  ;;  %v1937_v9 = vpack.c.bf16 %v888_v7, %v887_v6  ;;  %v889_v10 = vld [vmem:[%s2518_s11 + $0x50] sm:$0xff]  ;;  %v890_v11 = vld [vmem:[%s2518_s11 + $0x58] sm:$0xff]  ;;  %v1445_v7 = vld [vmem:[%s2522_s6] ss:$0 sm:$0xff] }
 0x3eb   :  { %v664_v16 = vmax.f32 %v625_v12, %v656_v14  ;;  %v1683_v17 = vpop.f32.mrb[10].mxu1  ;;  %1903 = vmatprep.subr.bf16.mxu1 %v1902_v13  ;;  %v1940_v12 = vpack.c.bf16 %v890_v11, %v889_v10  ;;  %v892_v14 = vld [vmem:[%s2518_s11 + $0x68] sm:$0xff] }
 0x3ec   :  { %v659_v18 = vmul.f32 0.01, %v1683_v17  ;;  %v635_v19 = vpop.f32.mrb[11].mxu1  ;;  %1905 = vmatpush3.bf16.msra.mxu1 %v1902_v13  ;;  %v891_v13 = vld [vmem:[%s2518_s11 + $0x60] sm:$0xff] }
 0x3ed   :  { %v1906_v20 = vpack.c.bf16 %v665_v15, %v664_v16  ;;  %v658_v21 = vmul.f32 0.01, %v635_v19  ;;  %v1943_v15 = vpack.c.bf16 %v892_v14, %v891_v13  ;;  %v893_v16 = vld [vmem:[%s2518_s11 + $0x70] sm:$0xff] }
 0x3ee   :  { %v667_v22 = vmax.f32 %v1683_v17, %v659_v18  ;;  %v894_v17 = vld [vmem:[%s2518_s11 + $0x78] sm:$0xff] }
 0x3ef   :  { %v666_v23 = vmax.f32 %v635_v19, %v658_v21  ;;  %v1686_v24 = vpop.f32.mrb[12].mxu1  ;;  %1907 = vmatprep.subr.bf16.mxu1 %v1906_v20  ;;  %v1946_v18 = vpack.c.bf16 %v894_v17, %v893_v16  ;;  %v2452_v19 = vld [vmem:[%s2520_s10] sm:$0xff] }
 0x3f0   :  { %v661_v25 = vmul.f32 0.01, %v1686_v24  ;;  %v645_v26 = vpop.f32.mrb[13].mxu1  ;;  %1909 = vmatpush3.bf16.msra.mxu1 %v1906_v20 }
 0x3f1   :  { %v1910_v27 = vpack.c.bf16 %v667_v22, %v666_v23  ;;  %v660_v28 = vmul.f32 0.01, %v645_v26  ;;  %v874_v23 = vld [vmem:[%s2520_s10 + $0x8] sm:$0xff] }
 0x3f2   :  { %v669_v29 = vmax.f32 %v1686_v24, %v661_v25 }
 0x3f3   :  { %v668_v30 = vmax.f32 %v645_v26, %v660_v28  ;;  %1911 = vmatprep.subr.bf16.mxu1 %v1910_v27 }
 0x3f4   :  { %1913 = vmatpush3.bf16.msra.mxu1 %v1910_v27  ;;  %v875_v27 = vld [vmem:[%s2520_s10 + $0x10] sm:$0xff] }
 0x3f5   :  { %v1914_v31 = vpack.c.bf16 %v669_v29, %v668_v30 }
 0x3f7   :  { %1915 = vmatprep.subr.bf16.mxu1 %v1914_v31 }
 0x3f8   :  { %1917 = vmatpush3.bf16.msra.mxu1 %v1914_v31 }
 0x3f9   :  { %1918 = vmatprep.subr.bf16.mxu1 %v1998_v4 }
 0x3fb   :  { %1704 = vmatmul.mubr.msk.f32.vlgmr.msra.gmra.mrb[14].mxu1 %vm674_vm2, %v671_v32 }
 0x3fc   :  { %1706 = vmatprep.mubr.msk.f32.mxu1 %vm674_vm2, %v672_v33 }
 0x3ff   :  { %1707 = vmatmul.mubr.msk.f32.gmra.mrb[16].mxu1 %vm674_vm2, %v673_v34 }
 0x400   :  { %1717 = vmatprep.mubr.msk.f32.mxu1 %vm1999_vm0, %v1997_v3 }
 0x4b3   :  { %v483_v36 = vpop.f32.mrb[2].mxu0 }
 0x4b4   :  { %v484_v37 = vadd.f32 %v1443_v35, %v483_v36  ;;  %v1672_v38 = vpop.f32.mrb[3].mxu0 }
 0x4b6   :  { %v2367_v39 = vadd.f32 %v484_v37, %v2225_v8  ;;  %v879_v8 = vld [vmem:[%s2518_s11] sm:$0xff] }
 0x4b7   :  { %v2380_v56 = vpack.c.bf16 %v880_v53, %v879_v8 }
 0x4b8   :  { %488 = vadd.xlane.f32.xlu0 %v2367_v39 }
 0x4b9   :  { %1951 = vmatpush3.bf16.xpose.msk.msra.mxu0 %vm1950_vm5, %v2380_v56 }
 0x4ba   :  { %1952 = vmatprep.subr.bf16.mxu0 %v1998_v4 }
 0x4c1   :  { %1955 = vmatpush3.bf16.xpose.msk.msra.mxu0 %vm1950_vm5, %v1928_v60 }
 0x4c2   :  { %1956 = vmatprep.subr.bf16.mxu0 %v1998_v4 }
 0x4c9   :  { %1959 = vmatpush3.bf16.xpose.msk.msra.mxu0 %vm1950_vm5, %v1931_v63 }
 0x4ca   :  { %1960 = vmatprep.subr.bf16.mxu0 %v1998_v4 }
 0x4ce   :  { %v1705_v40 = vpop.f32.mrb[14].mxu1 }
 0x4cf   :  { %v773_v41 = vmul.f32 0.01, %v1705_v40  ;;  %v753_v42 = vpop.f32.mrb[15].mxu1 }
 0x4d0   :  { %v772_v43 = vmul.f32 0.01, %v753_v42 }
 0x4d1   :  { %v777_v44 = vmax.f32 %v1705_v40, %v773_v41  ;;  %1963 = vmatpush3.bf16.xpose.msk.msra.mxu0 %vm1950_vm5, %v1934_v5 }
 0x4d2   :  { %v776_v45 = vmax.f32 %v753_v42, %v772_v43  ;;  %v1708_v46 = vpop.f32.mrb[16].mxu1  ;;  %1964 = vmatprep.subr.bf16.mxu0 %v1998_v4 }
 0x4d3   :  { %v775_v47 = vmul.f32 0.01, %v1708_v46  ;;  %v763_v48 = vpop.f32.mrb[17].mxu1 }
 0x4d4   :  { %v1919_v49 = vpack.c.bf16 %v777_v44, %v776_v45  ;;  %v774_v50 = vmul.f32 0.01, %v763_v48  ;;  %v491_v45 = vmul.f32 %v2367_v39, %v2367_v39 }
 0x4d5   :  { %v779_v51 = vmax.f32 %v1708_v46, %v775_v47 }
 0x4d6   :  { %v778_v52 = vmax.f32 %v763_v48, %v774_v50  ;;  %1920 = vmatpush3.bf16.msra.mxu1 %v1919_v49 }
 0x4d7   :  { %1921 = vmatprep.subr.bf16.mxu1 %v1998_v4 }
 0x4d8   :  { %v1922_v54 = vpack.c.bf16 %v779_v51, %v778_v52 }
 0x4d9   :  { %1967 = vmatpush3.bf16.xpose.msk.msra.mxu0 %vm1950_vm5, %v1937_v9 }
 0x4da   :  { %1923 = vmatpush3.bf16.msra.mxu1 %v1922_v54  ;;  %1968 = vmatprep.subr.bf16.mxu0 %v1998_v4 }
 0x4db   :  { %1924 = vmatprep.subr.bf16.mxu1 %v1998_v4 }
 0x4dd   :  { %1718 = vmatmul.mubr.msk.f32.vlgmr.msra.gmra.mrb[18].mxu1 %vm783_vm3, %v780_v55 }
 0x4de   :  { %1720 = vmatprep.mubr.msk.f32.mxu1 %vm1999_vm0, %v1997_v3  ;;  %1926 = vmatpush3.bf16.msra.mxu1 %v2380_v56 }
 0x4df   :  { %1927 = vmatprep.subr.bf16.mxu1 %v1998_v4 }
 0x4e1   :  { %1721 = vmatmul.mubr.msk.f32.gmra.mrb[20].mxu1 %vm783_vm3, %v781_v59  ;;  %1971 = vmatpush3.bf16.xpose.msk.msra.mxu0 %vm1950_vm5, %v1940_v12 }
 0x4e2   :  { %1929 = vmatpush3.bf16.msra.mxu1 %v1928_v60  ;;  %1723 = vmatprep.mubr.msk.f32.mxu1 %vm1999_vm0, %v1997_v3 }
 0x4e3   :  { %1930 = vmatprep.subr.bf16.mxu1 %v1998_v4  ;;  %1972 = vmatprep.subr.bf16.mxu0 %v1998_v4 }
 0x4e5   :  { %1724 = vmatmul.mubr.msk.f32.gmra.mrb[22].mxu1 %vm783_vm3, %v782_v0 }
 0x4e6   :  { %1932 = vmatpush3.bf16.msra.mxu1 %v1931_v63  ;;  %1758 = vmatprep.mubr.msk.f32.mxu1 %vm1999_vm0, %v1997_v3 }
 0x4e7   :  { %1933 = vmatprep.subr.bf16.mxu1 %v1998_v4 }
 0x4e9   :  { %1975 = vmatpush3.bf16.xpose.msk.msra.mxu0 %vm1950_vm5, %v1943_v15 }
 0x4ea   :  { %1935 = vmatpush3.bf16.msra.mxu1 %v1934_v5  ;;  %1976 = vmatprep.subr.bf16.mxu0 %v1998_v4 }
 0x4eb   :  { %1936 = vmatprep.subr.bf16.mxu1 %v1998_v4 }
 0x4ee   :  { %1938 = vmatpush3.bf16.msra.mxu1 %v1937_v9 }
 0x4ef   :  { %1939 = vmatprep.subr.bf16.mxu1 %v1998_v4 }
 0x4f1   :  { %1979 = vmatpush3.bf16.xpose.msk.msra.mxu0 %vm1950_vm5, %v1946_v18 }
 0x4f2   :  { %1941 = vmatpush3.bf16.msra.mxu1 %v1940_v12 }
 0x4f3   :  { %1942 = vmatprep.subr.bf16.mxu1 %v1998_v4 }
 0x4f6   :  { %1944 = vmatpush3.bf16.msra.mxu1 %v1943_v15 }
 0x4f7   :  { %1945 = vmatprep.subr.bf16.mxu1 %v1998_v4 }
 0x4fa   :  { %1947 = vmatpush3.bf16.msra.mxu1 %v1946_v18 }
 0x4fb   :  { %1767 = vmatprep.subr.mxu1 %v1997_v3 }
 0x545   :  { %v489_v51 = vpop.xlane.xlu0 %488 }
 0x546   :  { %v490_v8 = vmul.f32 0.0078125, %v489_v51 }
 0x548   :  { %v495_v54 = vmul.f32 %v490_v8, %v490_v8  ;;  %v497_v61 = vsub.f32 %v2367_v39, %v490_v8  ;;  %v1265_v39 = vld [vmem:[%s2523_s12] sm:$0x3] }
 0x5b0   :  { %v859_v20 = vpop.f32.mrb[18].mxu1 }
 0x5b1   :  { %v876_v21 = vmul.f32 %v2452_v19, %v859_v20  ;;  %v1719_v22 = vpop.f32.mrb[19].mxu1 }
 0x5b3   :  { %1759 = vmatmul.mubr.f32.vlgmr.msra.gmra.mrb[24].mxu1 %v876_v21 }
 0x5b4   :  { %v864_v24 = vpop.f32.mrb[20].mxu1  ;;  %1761 = vmatprep.mubr.msk.f32.mxu1 %vm1999_vm0, %v1997_v3 }
 0x5b5   :  { %v877_v25 = vmul.f32 %v874_v23, %v864_v24  ;;  %v1722_v26 = vpop.f32.mrb[21].mxu1 }
 0x5b7   :  { %1762 = vmatmul.mubr.f32.gmra.mrb[26].mxu1 %v877_v25 }
 0x5b8   :  { %v869_v28 = vpop.f32.mrb[22].mxu1  ;;  %1764 = vmatprep.mubr.msk.f32.mxu1 %vm1999_vm0, %v1997_v3 }
 0x5b9   :  { %v878_v29 = vmul.f32 %v875_v27, %v869_v28  ;;  %v1725_v30 = vpop.f32.mrb[23].mxu1 }
 0x5bb   :  { %1765 = vmatmul.mubr.f32.gmra.mrb[28].mxu1 %v878_v29 }
 0x5bc   :  { %1769 = vmatprep.mubr.msk.f32.mxu1 %vm1999_vm0, %v1997_v3 }
 0x686   :  { %v961_v31 = vpop.f32.mrb[24].mxu1 }
 0x687   :  { %v1760_v32 = vpop.f32.mrb[25].mxu1 }
 0x68a   :  { %v966_v33 = vpop.f32.mrb[26].mxu1 }
 0x68b   :  { %v1763_v34 = vpop.f32.mrb[27].mxu1  ;;  %1768 = vmatpush3.xpose.msk.msra.mxu1 %vm975_vm4, %v966_v33 }
 0x68c   :  { %1772 = vmatprep.subr.mxu1 %v1997_v3 }
 0x68e   :  { %1770 = vmatmul.mubr.msk.f32.vlgmr.msra.gmra.mrb[30].mxu1 %vm975_vm4, %v961_v31  ;;  %v971_v35 = vpop.f32.mrb[28].mxu1 }
 0x68f   :  { %v1766_v36 = vpop.f32.mrb[29].mxu1  ;;  %1773 = vmatpush3.msra.mxu1 %v971_v35  ;;  %1774 = vmatprep.mubr.msk.f32.mxu1 %vm1999_vm0, %v1997_v3 }
 0x690   :  { %1812 = vmatprep.subr.mxu1 %v1997_v3 }
 0x761   :  { %v1048_v4 = vpop.f32.mrb[30].mxu1 }
 0x762   :  { %v1771_v37 = vpop.f32.mrb[31].mxu1  ;;  %v1052_v38 = vsel %vm309_vm1, %v1048_v4, -inf }
 0x763   :  { %1053 = vmax.xlane.f32.xlu1 %v1052_v38 }
 0x7f0   :  { %v1054_v40 = vpop.xlane.xlu1 %1053 }
 0x7f1   :  { %v1055_v41 = vsub.f32 %v1048_v4, %v1054_v40 }
 0x7f3   :  { %v1056_v42 = vmul.f32 1.442695, %v1055_v41 }
 0x7f5   :  { %1987 = vpow2.f32 %v1056_v42 }
 0x7ff   :  { %v1988_v43 = vpop.eup %1987 }
 0x800   :  { %v1058_v44 = vsel %vm309_vm1, %v1988_v43, 0.0 }
 0x801   :  { %1059 = vadd.xlane.f32.xlu1 %v1058_v44 }
 0x805   :  { %492 = vadd.xlane.f32.xlu1 %v491_v45 }
 0x88e   :  { %v1060_v46 = vpop.xlane.xlu1 %1059 }
 0x88f   :  { %1989 = vrcp.f32 %v1060_v46 }
 0x892   :  { %v493_v52 = vpop.xlane.xlu1 %492 }
 0x893   :  { %v494_v53 = vmul.f32 0.0078125, %v493_v52 }
 0x895   :  { %v496_v55 = vsub.f32 %v494_v53, %v495_v54 }
 0x897   :  { %v498_v56 = vadd.f32 1e-05, %v496_v55 }
 0x899   :  { %v1990_v47 = vpop.eup %1989  ;;  %1991 = vrsqrt.f32 %v498_v56 }
 0x89a   :  { %v1062_v48 = vmul.f32 %v1990_v47, %v1988_v43 }
 0x89c   :  { %1775 = vmatmul.mubr.msk.f32.vlgmr.msra.gmra.mrb[32].mxu1 %vm309_vm1, %v1062_v48 }
 0x89d   :  { %1814 = vmatprep.mubr.msk.f32.mxu1 %vm1999_vm0, %v1997_v3 }
 0x8a3   :  { %v1992_v60 = vpop.eup %1991 }
 0x8a4   :  { %v500_v63 = vmul.f32 %v1992_v60, %v497_v61 }
 0x8a6   :  { %v508_v5 = vmul.f32 %v1444_v1, %v500_v63 }
 0x8a8   :  { %v516_v10 = vadd.f32 %v1445_v7, %v508_v5 }
 0x96f   :  { %v1132_v49 = vpop.f32.mrb[32].mxu1 }
 0x970   :  { %v1776_v50 = vpop.f32.mrb[33].mxu1  ;;  %1810 = vmatmul.mubr.msk.f32.vlgmr.msra.gmra.mrb[4].mxu0 %vm975_vm4, %v1132_v49 }
 0xa43   :  { %v1253_v57 = vpop.f32.mrb[4].mxu0 }
 0xa44   :  { %v1257_v58 = vmul.f32 %v1253_v57, %v2452_v19  ;;  %v1811_v59 = vpop.f32.mrb[5].mxu0 }
 0xa46   :  { %v1258_v62 = vrot.slane %v1257_v58, 4 }
 0xa48   :  { %v1259_v0 = vadd.f32 %v1258_v62, %v1257_v58 }
 0xa4a   :  { %v1260_v2 = vrot.slane %v1259_v0, 2 }
 0xa4c   :  { %v1261_v6 = vadd.f32 %v1260_v2, %v1259_v0 }
 0xa4e   :  { %v1262_v9 = vrot.slane %v1261_v6, 1 }
 0xa50   :  { %v1263_v11 = vadd.f32 %v1262_v9, %v1261_v6 }
 0xa52   :  { %v1264_v12 = vmul.f32 %v1263_v11, %v516_v10 }
 0xa54   :  { %1813 = vmatpush3.msk.msra.mxu1 %vm1270_vm6, %v1264_v12  ;;  %v1352_v13 = vmul.f32 %v1264_v12, %v1264_v12 }
 0xa55   :  { %1815 = vmatmul.mubr.msk.f32.vlgmr.msra.gmra.mrb[34].mxu1 %vm1266_vm7, %v1265_v39  ;;  %1817 = vmatprep.subr.mxu1 %v1997_v3 }
 0xa56   :  { %v1354_v14 = vsel %vm1353_vm8, %v1352_v13, 0.0  ;;  %1819 = vmatprep.mubr.msk.f32.mxu1 %vm1999_vm0, %v1997_v3  ;;  %v1434_v3 = vstv %s2524_s13 }
 0xa57   :  { %1355 = vadd.xlane.f32.xlu1 %v1354_v14 }
 0xae4   :  { %v1356_v19 = vpop.xlane.xlu1 %1355 }
 0xae5   :  { %v1357_v20 = vmax.f32 %v1356_v19, 1e-24 }
 0xae7   :  { %1993 = vrsqrt.f32 %v1357_v20 }
 0xaf1   :  { %v1994_v23 = vpop.eup %1993 }
 0xaf2   :  { %v1359_v25 = vmul.f32 %v1994_v23, %v1264_v12 }
 0xaf4   :  { %v1361_v27 = vrot.slane %v1359_v25, 4 }
 0xb28   :  { %v1340_v15 = vpop.f32.mrb[34].mxu1 }
 0xb29   :  { %v1344_v16 = vmul.f32 %v1340_v15, %v1340_v15  ;;  %v1816_v17 = vpop.f32.mrb[35].mxu1 }
 0xb2b   :  { %v1346_v18 = vsel %vm1345_vm9, %v1344_v16, 0.0 }
 0xb2c   :  { %1347 = vadd.xlane.f32.xlu0 %v1346_v18 }
 0xbb9   :  { %v1348_v21 = vpop.xlane.xlu0 %1347 }
 0xbba   :  { %v1349_v22 = vmax.f32 %v1348_v21, 1e-24 }
 0xbbc   :  { %1995 = vrsqrt.f32 %v1349_v22 }
 0xbc6   :  { %v1996_v24 = vpop.eup %1995 }
 0xbc7   :  { %v1351_v26 = vmul.f32 %v1996_v24, %v1340_v15 }
 0xbc9   :  { %1818 = vmatpush3.xpose.msra.mxu1 %v1351_v26 }
 0xbcc   :  { %1820 = vmatmul.mubr.f32.vlgmr.msra.gmra.mrb[36].mxu1 %v1361_v27 }
 0xc9f   :  { %v1429_v28 = vpop.f32.mrb[36].mxu1 }
 0xca0   :  { %v1435_v29 = vmul.f32 %v1434_v3, %v1429_v28  ;;  %v1821_v30 = vpop.f32.mrb[37].mxu1 }
 0xca2   :  { %1437 = vst.msk [vmem:[%s2525_s14] sm:$0xf] %vm1436_vm10, %v1435_v29 }

</bundles_post_ra>
